<compile_context>
chip_gen: v5e
topology: v5e:2x2
jax: 0.10.0
libtpu: 0.0.40
codegen_flags: <defaults>
</compile_context>

<pallas_src>
import jax
import jax.numpy as jnp
import numpy as np
from jax.experimental import pallas as pl
from jax.experimental.pallas import tpu as pltpu

LEAKY_SLOPE = 0.2  # nn.LeakyReLU(0.2) in FeatureLayer


def _feature_layer_kernel(p_ref, w_ref, loc_ref, scale_ref, o_ref):
    """One M row-tile per grid step.

    p_ref:     (tile_m, K)     im2col patches (K = 16*Cin, lane-dense)
    w_ref:     (K, Cout)       conv weights with taps folded into K (VMEM-resident)
    loc_ref:   (1, Cout)       ActNorm loc   (h = scale * (conv + loc))
    scale_ref: (1, Cout)       ActNorm scale
    o_ref:     (tile_m, Cout)  fused conv + norm + act output (lane-dense store)
    """
    acc = jnp.dot(p_ref[...], w_ref[...], preferred_element_type=jnp.float32)
    h = (acc + loc_ref[...]) * scale_ref[...]                 # ActNorm affine (f32)
    o_ref[...] = jnp.where(h >= 0.0, h, LEAKY_SLOPE * h).astype(o_ref.dtype)


def feature_layer_forward(x, w_hwio, an_loc, an_scale, *,
                          tile_m=256, mxu_dtype=jnp.float32):
    """x: (B, Cin, H, W) NCHW.  w_hwio: (4, 4, Cin, Cout).  Returns (B, Cout, H//2, W//2)."""
    B, Cin, H, W = x.shape
    KH, KW, _, Cout = w_hwio.shape
    assert KH == 4 and KW == 4 and H % 2 == 0 and W % 2 == 0
    Ho, Wo = H // 2, W // 2
    M = B * Ho * Wo
    K = KH * KW * Cin

    # ---- Host-side im2col (one-time layout plumbing; stride-2 / pad-1 tap extract) ----
    # TODO(synk): when FeatureLayers are stacked, keep activations in this lane-dense
    # NHWC/slab layout between layers and drop the NCHW<->NHWC transposes entirely.
    x_nhwc = jnp.transpose(x, (0, 2, 3, 1))                       # (B, H, W, Cin)
    x_pad = jnp.pad(x_nhwc, ((0, 0), (1, 1), (1, 1), (0, 0)))     # (B, H+2, W+2, Cin)
    taps = [x_pad[:, kh:kh + 2 * Ho:2, kw:kw + 2 * Wo:2, :]       # each (B, Ho, Wo, Cin)
            for kh in range(KH) for kw in range(KW)]
    patches = jnp.concatenate(taps, axis=-1).reshape(M, K)        # (M, 16*Cin), (kh,kw,cin) order
    patches = patches.astype(mxu_dtype)

    # Weight reshape matches the tap concatenation order (kh, kw, cin).
    w2 = w_hwio.reshape(K, Cout).astype(mxu_dtype)
    loc2 = an_loc.reshape(1, Cout).astype(jnp.float32)
    scale2 = an_scale.reshape(1, Cout).astype(jnp.float32)

    # ---- M tiling: batch+space folded into row tiles; pad M up to a tile multiple ----
    tile_m = min(tile_m, M)            # tile_m==M (full dim) or a multiple of 8 (256/128)
    num_tiles = pl.cdiv(M, tile_m)
    Mp = num_tiles * tile_m
    if Mp != M:
        patches = jnp.pad(patches, ((0, Mp - M), (0, 0)))

    out = pl.pallas_call(
        _feature_layer_kernel,
        out_shape=jax.ShapeDtypeStruct((Mp, Cout), jnp.float32),
        grid=(num_tiles,),
        in_specs=[
            # per-tile activation block (double-buffered by the pipeline)
            pl.BlockSpec((tile_m, K), lambda m: (m, 0)),
            # weights / ActNorm params: constant block index -> stay resident in VMEM
            pl.BlockSpec((K, Cout), lambda m: (0, 0)),
            pl.BlockSpec((1, Cout), lambda m: (0, 0)),
            pl.BlockSpec((1, Cout), lambda m: (0, 0)),
        ],
        out_specs=pl.BlockSpec((tile_m, Cout), lambda m: (m, 0)),
        compiler_params=pltpu.CompilerParams(
            dimension_semantics=("parallel",)),
    )(patches, w2, loc2, scale2)

    # lane-dense slab -> NCHW (module interface only; drop when stacking layers)
    out = out[:M].reshape(B, Ho, Wo, Cout)
    return jnp.transpose(out, (0, 3, 1, 2))


def _reference_forward(x, w_hwio, an_loc, an_scale):
    """Pure-JAX reference: Conv2d(4,2,1,no bias) -> ActNorm affine -> LeakyReLU(0.2)."""
    y = jax.lax.conv_general_dilated(
        x, w_hwio, window_strides=(2, 2), padding=((1, 1), (1, 1)),
        dimension_numbers=("NCHW", "HWIO", "NCHW"),
        precision=jax.lax.Precision.HIGHEST)
    y = (y + an_loc.reshape(1, -1, 1, 1)) * an_scale.reshape(1, -1, 1, 1)
    return jnp.where(y >= 0.0, y, LEAKY_SLOPE * y)


if __name__ == "__main__":
    # FeatureLayer(scale=1, in_channels=4, norm='AN', width_multiplier=1)
    #   -> out_channels = int(1 * 64 * min(2**1, 16)) = 128
    B = 2
    in_channels = 4
    out_channels = int(1 * 64 * min(2 ** 1, 16))   # 128
    H = W = 16

    key = jax.random.PRNGKey(0)
    kx, kw, kl, ks = jax.random.split(key, 4)

    x = jax.random.normal(kx, (B, in_channels, H, W), jnp.float32)

    # Conv2d weight (no bias), generated directly in HWIO layout.
    fan_in = in_channels * 4 * 4
    bound = 1.0 / np.sqrt(fan_in)
    w = jax.random.uniform(kw, (4, 4, in_channels, out_channels), jnp.float32, -bound, bound)

    # ActNorm parameters (steady-state / post-initialization values).
    # TODO(synk): ActNorm's data-dependent first-forward initialization (per-channel
    # mean/std of the conv output) is a one-time host-side statistic and is not
    # reproduced here; the kernel implements the steady-state affine forward.
    an_loc = 0.1 * jax.random.normal(kl, (out_channels,), jnp.float32)
    an_scale = 1.0 + 0.1 * jax.random.normal(ks, (out_channels,), jnp.float32)

    out = feature_layer_forward(x, w, an_loc, an_scale)
    out = jax.block_until_ready(out)

    ref = _reference_forward(x, w, an_loc, an_scale)
    ref = jax.block_until_ready(ref)

    assert out.shape == (B, out_channels, H // 2, W // 2)
    np.testing.assert_allclose(np.asarray(out), np.asarray(ref), rtol=1e-3, atol=1e-5)

    print("KERNEL_OK")
</pallas_src>

<mosaic_0001>
module attributes {stable_mosaic.version = 11 : i64} {
  func.func @_feature_layer_kernel(%arg0: i32, %arg1: memref<128x64xf32, #tpu.memory_space<vmem>>, %arg2: memref<64x128xf32, #tpu.memory_space<vmem>>, %arg3: memref<1x128xf32, #tpu.memory_space<vmem>>, %arg4: memref<1x128xf32, #tpu.memory_space<vmem>>, %arg5: memref<128x128xf32, #tpu.memory_space<vmem>>) attributes {dimension_semantics = [#tpu.dimension_semantics<parallel>], iteration_bounds = array<i64: 1>, scalar_prefetch = 0 : i64, scratch_operands = 0 : i64, tpu.core_type = #tpu.core_type<tc>, window_params = [{transform_indices = @transform_0, window_bounds = array<i64: 128, 64>}, {pipeline_mode = #tpu.pipeline_mode<synchronous>, transform_indices = @transform_1, window_bounds = array<i64: 64, 128>}, {pipeline_mode = #tpu.pipeline_mode<synchronous>, transform_indices = @transform_2, window_bounds = array<i64: 1, 128>}, {pipeline_mode = #tpu.pipeline_mode<synchronous>, transform_indices = @transform_3, window_bounds = array<i64: 1, 128>}, {transform_indices = @transform_4, window_bounds = array<i64: 128, 128>}]} {
    %c0 = arith.constant 0 : index
    %c0_0 = arith.constant 0 : index
    %0 = vector.load %arg1[%c0, %c0_0] : memref<128x64xf32, #tpu.memory_space<vmem>>, vector<128x64xf32>
    %c0_1 = arith.constant 0 : index
    %c0_2 = arith.constant 0 : index
    %1 = vector.load %arg2[%c0_1, %c0_2] : memref<64x128xf32, #tpu.memory_space<vmem>>, vector<64x128xf32>
    %cst = arith.constant dense<0.000000e+00> : vector<128x128xf32>
    %2 = tpu.matmul %0, %1, %cst {dimension_numbers = #tpu.dot_dimension_numbers<[1], [0], [0], [1], [0, 0, 1, 1], [], []>} : vector<128x64xf32>, vector<64x128xf32>, vector<128x128xf32> -> vector<128x128xf32>
    %c0_3 = arith.constant 0 : index
    %c0_4 = arith.constant 0 : index
    %3 = vector.load %arg3[%c0_3, %c0_4] : memref<1x128xf32, #tpu.memory_space<vmem>>, vector<1x128xf32>
    %4 = vector.broadcast %3 : vector<1x128xf32> to vector<128x128xf32>
    %5 = arith.addf %2, %4 : vector<128x128xf32>
    %c0_5 = arith.constant 0 : index
    %c0_6 = arith.constant 0 : index
    %6 = vector.load %arg4[%c0_5, %c0_6] : memref<1x128xf32, #tpu.memory_space<vmem>>, vector<1x128xf32>
    %7 = vector.broadcast %6 : vector<1x128xf32> to vector<128x128xf32>
    %8 = arith.mulf %5, %7 : vector<128x128xf32>
    %cst_7 = arith.constant 0.000000e+00 : f32
    %9 = vector.broadcast %cst_7 : f32 to vector<128x128xf32>
    %10 = arith.cmpf oge, %8, %9 : vector<128x128xf32>
    %cst_8 = arith.constant 2.000000e-01 : f32
    %11 = vector.broadcast %cst_8 : f32 to vector<128x128xf32>
    %12 = arith.mulf %11, %8 : vector<128x128xf32>
    %13 = arith.select %10, %8, %12 : vector<128x128xi1>, vector<128x128xf32>
    %c0_9 = arith.constant 0 : index
    %c0_10 = arith.constant 0 : index
    %14 = vector.load %arg5[%c0_9, %c0_10] : memref<128x128xf32, #tpu.memory_space<vmem>>, vector<128x128xf32>
    tpu.vector_store %arg5[%c0_9, %c0_10], %13 {strides = array<i32>} : memref<128x128xf32, #tpu.memory_space<vmem>>, vector<128x128xf32>,
    return
  }
  func.func @transform_0(%arg0: i32) -> (i32, i32) {
    %c0_i32 = arith.constant 0 : i32
    %c0_i32_0 = arith.constant 0 : i32
    return %arg0, %c0_i32 : i32, i32
  }
  func.func @transform_1(%arg0: i32) -> (i32, i32) {
    %c0_i32 = arith.constant 0 : i32
    %c0_i32_0 = arith.constant 0 : i32
    %c0_i32_1 = arith.constant 0 : i32
    return %c0_i32, %c0_i32_0 : i32, i32
  }
  func.func @transform_2(%arg0: i32) -> (i32, i32) {
    %c0_i32 = arith.constant 0 : i32
    %c0_i32_0 = arith.constant 0 : i32
    %c0_i32_1 = arith.constant 0 : i32
    return %c0_i32, %c0_i32_0 : i32, i32
  }
  func.func @transform_3(%arg0: i32) -> (i32, i32) {
    %c0_i32 = arith.constant 0 : i32
    %c0_i32_0 = arith.constant 0 : i32
    %c0_i32_1 = arith.constant 0 : i32
    return %c0_i32, %c0_i32_0 : i32, i32
  }
  func.func @transform_4(%arg0: i32) -> (i32, i32) {
    %c0_i32 = arith.constant 0 : i32
    %c0_i32_0 = arith.constant 0 : i32
    return %arg0, %c0_i32 : i32, i32
  }
}

</mosaic_0001>

<bundles_post_ra>
// kernel: tpu_custom_call.1
= control target key start
LH: loop header
LB: loop body
LE: loop exit
PB: predicated region body
PF: predicated region fallthrough
CT: control target
= control target key end

     0   :  { %s494_s0 = inlined_call_operand.vmem [shape: f32[128,64], index: 0, kind: input, shape index: {}]   ;;  %s495_s1 = inlined_call_operand.vmem [shape: f32[64,128], index: 1, kind: input, shape index: {}]   ;;  %s496_s2 = inlined_call_operand.vmem [shape: f32[1,128], index: 2, kind: input, shape index: {}]   ;;  %s497_s3 = inlined_call_operand.vmem [shape: f32[1,128], index: 3, kind: input, shape index: {}]   ;;  %s498_s4 = inlined_call_operand.hbm [shape: f32[128,128], index: 4, kind: output, shape index: {}]  }
   0x1   :  { %v41_v0 = vld [vmem:[%s495_s1 + $0x38] sm:$0xff]  ;;  %v40_v1 = vld [vmem:[%s495_s1 + $0x30] sm:$0xff]  ;;  %v39_v2 = vld [vmem:[%s495_s1 + $0x28] sm:$0xff] }
   0x2   :  { %279 = vmatpush.msra.mxu2 %v41_v0  ;;  %280 = vmatpush.msra.mxu3 %v41_v0  ;;  %v38_v3 = vld [vmem:[%s495_s1 + $0x20] sm:$0xff]  ;;  %v37_v4 = vld [vmem:[%s495_s1 + $0x18] sm:$0xff]  ;;  %v36_v5 = vld [vmem:[%s495_s1 + $0x10] sm:$0xff] }
   0x3   :  { %103 = vmatpush.msra.mxu0 %v41_v0  ;;  %278 = vmatpush.msra.mxu1 %v41_v0 }
   0x4   :  { %282 = vmatpush.msra.mxu2 %v40_v1  ;;  %283 = vmatpush.msra.mxu3 %v40_v1 }
   0x5   :  { %104 = vmatpush.msra.mxu0 %v40_v1  ;;  %281 = vmatpush.msra.mxu1 %v40_v1 }
   0x6   :  { %285 = vmatpush.msra.mxu2 %v39_v2  ;;  %286 = vmatpush.msra.mxu3 %v39_v2 }
   0x7   :  { %105 = vmatpush.msra.mxu0 %v39_v2  ;;  %284 = vmatpush.msra.mxu1 %v39_v2 }
   0x8   :  { %288 = vmatpush.msra.mxu2 %v38_v3  ;;  %289 = vmatpush.msra.mxu3 %v38_v3 }
   0x9   :  { %106 = vmatpush.msra.mxu0 %v38_v3  ;;  %287 = vmatpush.msra.mxu1 %v38_v3 }
   0xa   :  { %9 = vsyncpa [#allocation3], 0  ;;  %291 = vmatpush.msra.mxu2 %v37_v4  ;;  %292 = vmatpush.msra.mxu3 %v37_v4  ;;  %v35_v6 = vld [vmem:[%s495_s1 + $0x8] sm:$0xff]  ;;  %v34_v7 = vld [vmem:[%s495_s1] sm:$0xff]  ;;  %vm46_vm0 = vcmask 523264   ;;  %s250_s14 = sshll.u32 %s498_s4, 4  ;;  %s251_s14 = int_to_ptr.hbm [resolvable:$true] %s250_s14 }
   0xb   :  { %107 = vmatpush.msra.mxu0 %v37_v4  ;;  %290 = vmatpush.msra.mxu1 %v37_v4  ;;  %v26_v8 = vld [vmem:[%s494_s0 + $0x40] sm:$0xff]  ;;  %v27_v12 = vld [vmem:[%s494_s0 + $0x48] sm:$0xff]  ;;  %v28_v16 = vld [vmem:[%s494_s0 + $0x50] sm:$0xff]  ;;  %s334_s15 = smov 128   ;;  %s335_s16 = smov 8  }
   0xc   :  { %294 = vmatpush.msra.mxu2 %v36_v5  ;;  %295 = vmatpush.msra.mxu3 %v36_v5  ;;  %v30_v9 = vld [vmem:[%s494_s0 + $0x60] sm:$0xff]  ;;  %v31_v13 = vld [vmem:[%s494_s0 + $0x68] sm:$0xff]  ;;  %v32_v17 = vld [vmem:[%s494_s0 + $0x70] sm:$0xff] }
   0xd   :  { %108 = vmatpush.msra.mxu0 %v36_v5  ;;  %293 = vmatpush.msra.mxu1 %v36_v5  ;;  %v18_v10 = vld [vmem:[%s494_s0] sm:$0xff]  ;;  %v19_v14 = vld [vmem:[%s494_s0 + $0x8] sm:$0xff]  ;;  %v20_v18 = vld [vmem:[%s494_s0 + $0x10] sm:$0xff] }
   0xe   :  { %297 = vmatpush.msra.mxu2 %v35_v6  ;;  %298 = vmatpush.msra.mxu3 %v35_v6  ;;  %v22_v11 = vld [vmem:[%s494_s0 + $0x20] sm:$0xff]  ;;  %v23_v15 = vld [vmem:[%s494_s0 + $0x28] sm:$0xff]  ;;  %v24_v19 = vld [vmem:[%s494_s0 + $0x30] sm:$0xff] }
   0xf   :  { %109 = vmatpush.msra.mxu0 %v35_v6  ;;  %296 = vmatpush.msra.mxu1 %v35_v6  ;;  %v29_v20 = vld [vmem:[%s494_s0 + $0x58] sm:$0xff]  ;;  %v452_v24 = vld [vmem:[%s496_s2] ss:$0 sm:$0xff] }
  0x10   :  { %300 = vmatpush.msra.mxu2 %v34_v7  ;;  %301 = vmatpush.msra.mxu3 %v34_v7  ;;  %v33_v21 = vld [vmem:[%s494_s0 + $0x78] sm:$0xff]  ;;  %v457_v25 = vld [vmem:[%s497_s3] ss:$0 sm:$0xff] }
  0x11   :  { %270 = vmatmul.msk.f32.vlgmr.msra.gmra.mxu2 %vm46_vm0, %v26_v8  ;;  %274 = vmatmul.msk.f32.vlgmr.msra.gmra.mxu3 %vm46_vm0, %v30_v9  ;;  %v21_v22 = vld [vmem:[%s494_s0 + $0x18] sm:$0xff] }
  0x12   :  { %110 = vmatpush.msra.mxu0 %v34_v7  ;;  %299 = vmatpush.msra.mxu1 %v34_v7  ;;  %v25_v23 = vld [vmem:[%s494_s0 + $0x38] sm:$0xff]  ;;  %s333_s0 = smov [#allocation2]  }
  0x13   :  { %262 = vmatmul.msk.f32.vlgmr.msra.gmra.mxu0 %vm46_vm0, %v18_v10  ;;  %266 = vmatmul.msk.f32.vlgmr.msra.gmra.mxu1 %vm46_vm0, %v22_v11  ;;  %s248_s2 = sshll.u32 %s333_s0, 4  ;;  %s249_s2 = int_to_ptr.vmem [resolvable:$true] %s248_s2 }
  0x19   :  { %271 = vmatmul.msk.f32.gmra.mxu2 %vm46_vm0, %v27_v12  ;;  %275 = vmatmul.msk.f32.gmra.mxu3 %vm46_vm0, %v31_v13 }
  0x1b   :  { %263 = vmatmul.msk.f32.gmra.mxu0 %vm46_vm0, %v19_v14  ;;  %267 = vmatmul.msk.f32.gmra.mxu1 %vm46_vm0, %v23_v15 }
  0x21   :  { %272 = vmatmul.msk.f32.gmra.mxu2 %vm46_vm0, %v28_v16  ;;  %276 = vmatmul.msk.f32.gmra.mxu3 %vm46_vm0, %v32_v17 }
  0x23   :  { %264 = vmatmul.msk.f32.gmra.mxu0 %vm46_vm0, %v20_v18  ;;  %268 = vmatmul.msk.f32.gmra.mxu1 %vm46_vm0, %v24_v19 }
  0x29   :  { %273 = vmatmul.msk.f32.gmra.mxu2 %vm46_vm0, %v29_v20  ;;  %277 = vmatmul.msk.f32.gmra.mxu3 %vm46_vm0, %v33_v21 }
  0x2b   :  { %265 = vmatmul.msk.f32.gmra.mxu0 %vm46_vm0, %v21_v22  ;;  %269 = vmatmul.msk.f32.gmra.mxu1 %vm46_vm0, %v25_v23 }
  0x90   :  { %v112_v26 = vpop.f32.mrf.mxu0  ;;  %v124_v27 = vpop.f32.mrf.mxu1 }
  0x91   :  { %v113_v28 = vadd.f32 %v452_v24, %v112_v26  ;;  %v125_v29 = vadd.f32 %v452_v24, %v124_v27 }
  0x93   :  { %v164_v30 = vmul.f32 %v457_v25, %v113_v28  ;;  %v168_v31 = vmul.f32 %v457_v25, %v125_v29 }
  0x94   :  { %v136_v32 = vpop.f32.mrf.mxu2  ;;  %v148_v33 = vpop.f32.mrf.mxu3 }
  0x95   :  { %vm180_vm1 = vcmp.ge.f32.partialorder %v164_v30, 0.0  ;;  %v196_v34 = vmul.f32 0.2, %v164_v30  ;;  %vm184_vm2 = vcmp.ge.f32.partialorder %v168_v31, 0.0  ;;  %v200_v35 = vmul.f32 0.2, %v168_v31 }
  0x96   :  { %v137_v36 = vadd.f32 %v452_v24, %v136_v32  ;;  %v149_v37 = vadd.f32 %v452_v24, %v148_v33 }
  0x97   :  { %v212_v38 = vsel %vm180_vm1, %v164_v30, %v196_v34  ;;  %v216_v39 = vsel %vm184_vm2, %v168_v31, %v200_v35 }
  0x98   :  { %228 = vst [vmem:[#allocation2] sm:$0xff] %v212_v38  ;;  %v172_v40 = vmul.f32 %v457_v25, %v137_v36  ;;  %v176_v41 = vmul.f32 %v457_v25, %v149_v37  ;;  %v115_v42 = vpop.f32.mrf.mxu0  ;;  %v127_v43 = vpop.f32.mrf.mxu1 }
  0x99   :  { %232 = vst [vmem:[#allocation2 + $0x20] sm:$0xff] %v216_v39  ;;  %v116_v44 = vadd.f32 %v452_v24, %v115_v42  ;;  %v128_v45 = vadd.f32 %v452_v24, %v127_v43 }
  0x9a   :  { %vm188_vm3 = vcmp.ge.f32.partialorder %v172_v40, 0.0  ;;  %v204_v46 = vmul.f32 0.2, %v172_v40  ;;  %vm192_vm4 = vcmp.ge.f32.partialorder %v176_v41, 0.0  ;;  %v208_v47 = vmul.f32 0.2, %v176_v41 }
  0x9b   :  { %v165_v48 = vmul.f32 %v457_v25, %v116_v44  ;;  %v169_v49 = vmul.f32 %v457_v25, %v128_v45 }
  0x9c   :  { %v220_v50 = vsel %vm188_vm3, %v172_v40, %v204_v46  ;;  %v224_v51 = vsel %vm192_vm4, %v176_v41, %v208_v47  ;;  %v139_v52 = vpop.f32.mrf.mxu2  ;;  %v151_v53 = vpop.f32.mrf.mxu3 }
  0x9d   :  { %236 = vst [vmem:[#allocation2 + $0x40] sm:$0xff] %v220_v50  ;;  %vm181_vm5 = vcmp.ge.f32.partialorder %v165_v48, 0.0  ;;  %v197_v54 = vmul.f32 0.2, %v165_v48  ;;  %vm185_vm6 = vcmp.ge.f32.partialorder %v169_v49, 0.0  ;;  %v140_v55 = vadd.f32 %v452_v24, %v139_v52 }
  0x9e   :  { %240 = vst [vmem:[#allocation2 + $0x60] sm:$0xff] %v224_v51  ;;  %v201_v56 = vmul.f32 0.2, %v169_v49  ;;  %v152_v57 = vadd.f32 %v452_v24, %v151_v53 }
  0x9f   :  { %v213_v58 = vsel %vm181_vm5, %v165_v48, %v197_v54  ;;  %v173_v59 = vmul.f32 %v457_v25, %v140_v55 }
  0xa0   :  { %229 = vst [vmem:[#allocation2 + $0x8] sm:$0xff] %v213_v58  ;;  %v217_v60 = vsel %vm185_vm6, %v169_v49, %v201_v56  ;;  %v177_v61 = vmul.f32 %v457_v25, %v152_v57  ;;  %v118_v62 = vpop.f32.mrf.mxu0  ;;  %v130_v63 = vpop.f32.mrf.mxu1 }
  0xa1   :  { %233 = vst [vmem:[#allocation2 + $0x28] sm:$0xff] %v217_v60  ;;  %vm189_vm7 = vcmp.ge.f32.partialorder %v173_v59, 0.0  ;;  %v205_v0 = vmul.f32 0.2, %v173_v59  ;;  %v119_v1 = vadd.f32 %v452_v24, %v118_v62  ;;  %v131_v2 = vadd.f32 %v452_v24, %v130_v63 }
  0xa2   :  { %vm193_vm8 = vcmp.ge.f32.partialorder %v177_v61, 0.0  ;;  %v209_v3 = vmul.f32 0.2, %v177_v61 }
  0xa3   :  { %v221_v4 = vsel %vm189_vm7, %v173_v59, %v205_v0  ;;  %v166_v5 = vmul.f32 %v457_v25, %v119_v1  ;;  %v170_v6 = vmul.f32 %v457_v25, %v131_v2 }
  0xa4   :  { %237 = vst [vmem:[#allocation2 + $0x48] sm:$0xff] %v221_v4  ;;  %v225_v7 = vsel %vm193_vm8, %v177_v61, %v209_v3  ;;  %v142_v8 = vpop.f32.mrf.mxu2  ;;  %v154_v9 = vpop.f32.mrf.mxu3 }
  0xa5   :  { %241 = vst [vmem:[#allocation2 + $0x68] sm:$0xff] %v225_v7  ;;  %vm182_vm9 = vcmp.ge.f32.partialorder %v166_v5, 0.0  ;;  %v198_v10 = vmul.f32 0.2, %v166_v5  ;;  %vm186_vm10 = vcmp.ge.f32.partialorder %v170_v6, 0.0  ;;  %v143_v11 = vadd.f32 %v452_v24, %v142_v8 }
  0xa6   :  { %v202_v12 = vmul.f32 0.2, %v170_v6  ;;  %v155_v13 = vadd.f32 %v452_v24, %v154_v9 }
  0xa7   :  { %v214_v14 = vsel %vm182_vm9, %v166_v5, %v198_v10  ;;  %v174_v15 = vmul.f32 %v457_v25, %v143_v11 }
  0xa8   :  { %230 = vst [vmem:[#allocation2 + $0x10] sm:$0xff] %v214_v14  ;;  %v218_v16 = vsel %vm186_vm10, %v170_v6, %v202_v12  ;;  %v178_v17 = vmul.f32 %v457_v25, %v155_v13  ;;  %v121_v18 = vpop.f32.mrf.mxu0  ;;  %v133_v19 = vpop.f32.mrf.mxu1 }
  0xa9   :  { %234 = vst [vmem:[#allocation2 + $0x30] sm:$0xff] %v218_v16  ;;  %vm190_vm11 = vcmp.ge.f32.partialorder %v174_v15, 0.0  ;;  %v206_v20 = vmul.f32 0.2, %v174_v15  ;;  %v122_v21 = vadd.f32 %v452_v24, %v121_v18  ;;  %v134_v22 = vadd.f32 %v452_v24, %v133_v19 }
  0xaa   :  { %vm194_vm12 = vcmp.ge.f32.partialorder %v178_v17, 0.0  ;;  %v210_v23 = vmul.f32 0.2, %v178_v17 }
  0xab   :  { %v222_v26 = vsel %vm190_vm11, %v174_v15, %v206_v20  ;;  %v167_v27 = vmul.f32 %v457_v25, %v122_v21  ;;  %v171_v28 = vmul.f32 %v457_v25, %v134_v22 }
  0xac   :  { %238 = vst [vmem:[#allocation2 + $0x50] sm:$0xff] %v222_v26  ;;  %v226_v29 = vsel %vm194_vm12, %v178_v17, %v210_v23  ;;  %v145_v30 = vpop.f32.mrf.mxu2  ;;  %v157_v31 = vpop.f32.mrf.mxu3 }
  0xad   :  { %242 = vst [vmem:[#allocation2 + $0x70] sm:$0xff] %v226_v29  ;;  %vm183_vm13 = vcmp.ge.f32.partialorder %v167_v27, 0.0  ;;  %v199_v32 = vmul.f32 0.2, %v167_v27  ;;  %vm187_vm14 = vcmp.ge.f32.partialorder %v171_v28, 0.0  ;;  %v146_v33 = vadd.f32 %v452_v24, %v145_v30 }
  0xae   :  { %v203_v34 = vmul.f32 0.2, %v171_v28  ;;  %v158_v35 = vadd.f32 %v452_v24, %v157_v31 }
  0xaf   :  { %v215_v36 = vsel %vm183_vm13, %v167_v27, %v199_v32  ;;  %v175_v37 = vmul.f32 %v457_v25, %v146_v33 }
  0xb0   :  { %231 = vst [vmem:[#allocation2 + $0x18] sm:$0xff] %v215_v36  ;;  %v219_v38 = vsel %vm187_vm14, %v171_v28, %v203_v34  ;;  %v179_v39 = vmul.f32 %v457_v25, %v158_v35 }
  0xb1   :  { %235 = vst [vmem:[#allocation2 + $0x38] sm:$0xff] %v219_v38  ;;  %vm191_vm15 = vcmp.ge.f32.partialorder %v175_v37, 0.0  ;;  %v207_v40 = vmul.f32 0.2, %v175_v37 }
  0xb2   :  { %vm195_vm0 = vcmp.ge.f32.partialorder %v179_v39, 0.0  ;;  %v211_v41 = vmul.f32 0.2, %v179_v39 }
  0xb3   :  { %v223_v24 = vsel %vm191_vm15, %v175_v37, %v207_v40 }
  0xb4   :  { %239 = vst [vmem:[#allocation2 + $0x58] sm:$0xff] %v223_v24  ;;  %v227_v42 = vsel %vm195_vm0, %v179_v39, %v211_v41 }
  0xb5   :  { %243 = vst [vmem:[#allocation2 + $0x78] sm:$0xff] %v227_v42 }
  0xb6   :  { %256 = dma.vmem_to_hbm [thread:$0]  %s249_s2, 2048, %s251_s14, [#allocation3], %s334_s15, %s334_s15, %s335_s16  }
  0xb7   :  { %331 = dma.done.wait [#allocation3], 2048  }
  0xb8   :  { %332 = vsyncadd [#allocation3], 4294965248 }
  0xb9   :  { %261 = vsyncpa [#allocation3], 1 }

</bundles_post_ra>
